<compile_context>
chip_gen: v6e
topology: v6e:2x2x1
jax: 0.10.0
libtpu: 0.0.40
codegen_flags: <defaults>
</compile_context>

<pallas_src>
import functools

import jax
import jax.numpy as jnp
from jax import lax
from jax.experimental import pallas as pl
from jax.experimental.pallas import tpu as pltpu

EPS = 1e-5
MOM = 0.9


def _bn1d_kernel(x_ref, w_ref, b_ref, rm_ref, y_ref, rm_out_ref,
                 sum_ref, sq_ref, scale_ref, shift_ref,
                 *, n_rows, nb, bt, mask_rows):
    """Two-phase BatchNorm1d over one feature tile.

    Grid axis 1 has 2*nb steps: p in [0, nb) accumulates per-feature sum and
    sum-of-squares (f32) over batch tiles; stats/affine are finalized at
    p == nb-1; p in [nb, 2*nb) writes y = scale*x + shift.
    """
    p = pl.program_id(1)

    @pl.when(p == 0)
    def _init():
        sum_ref[...] = jnp.zeros_like(sum_ref)
        sq_ref[...] = jnp.zeros_like(sq_ref)

    @pl.when(p < nb)
    def _accumulate():
        xf = x_ref[...].astype(jnp.float32)                       # (bt, ft)
        if mask_rows:
            # Partial last batch tile: zero out rows past the true batch size
            # so they don't pollute the statistics.
            row = p * bt + lax.broadcasted_iota(jnp.int32, xf.shape, 0)
            xf = jnp.where(row < n_rows, xf, 0.0)
        sum_ref[...] += jnp.sum(xf, axis=0, keepdims=True)
        sq_ref[...] += jnp.sum(xf * xf, axis=0, keepdims=True)

    @pl.when(p == nb - 1)
    def _finalize():
        n = jnp.float32(n_rows)
        mu = sum_ref[...] / n                                      # (1, ft)
        # Unbiased variance (torch.var default, /(N-1)).
        # NOTE: N == 1 divides by zero and yields nan/inf, like the module.
        var = (sq_ref[...] - n * mu * mu) / (n - 1.0)
        inv_std = lax.rsqrt(var + EPS)
        scale = w_ref[...].astype(jnp.float32) * inv_std
        scale_ref[...] = scale
        shift_ref[...] = b_ref[...].astype(jnp.float32) - scale * mu
        rm_out_ref[...] = (rm_ref[...].astype(jnp.float32) * MOM
                           + mu * (1.0 - MOM)).astype(rm_out_ref.dtype)

    @pl.when(p >= nb)
    def _normalize():
        xf = x_ref[...].astype(jnp.float32)
        y_ref[...] = (scale_ref[...] * xf + shift_ref[...]).astype(y_ref.dtype)


def _round_up(v, m):
    return ((v + m - 1) // m) * m


def _vmem_capacity_bytes():
    try:
        return int(pltpu.get_tpu_info().vmem_capacity_bytes)
    except Exception:
        return 64 << 20  # conservative: v7x per-TensorCore VMEM


def _select_tiles(n, f, in_itemsize, out_itemsize):
    """Pick (batch_tile, feature_tile, n_batch_tiles) from a VMEM byte budget."""
    vmem_cap = _vmem_capacity_bytes()
    # ~1/3 of VMEM for the x/y-sized live buffers: ~42 MiB on 128 MiB parts
    # (v5e/v6e), ~21 MiB on v7x's 64 MiB.
    budget = max(8 << 20, vmem_cap // 3)
    # Live bytes per tile element: double-buffered x in, double-buffered y out,
    # plus one f32 compute temp.
    per_elem = 2 * in_itemsize + 2 * out_itemsize + 4
    max_elems = max(8 * 128, budget // per_elem)

    f_round = _round_up(f, 128)
    if n * 128 <= max_elems:
        # Whole batch fits in one tile: go as lane-wide as VMEM allows.
        bt = n
        ft = max(128, min(f_round, (max_elems // max(n, 1)) // 128 * 128))
    else:
        # Huge batch: tile the batch axis too (stats accumulated in scratch).
        ft = min(f_round, 512)
        bt = max(8, min(_round_up(n, 8), (max_elems // ft) // 8 * 8))

    # Guarantee >= 2 feature tiles (when possible) so the "parallel" feature
    # axis can shard across both TensorCores on v7x megacore; one extra grid
    # step (~0.35us) is negligible on single-core parts.
    if pl.cdiv(f, ft) < 2 and f > 128:
        ft = _round_up(pl.cdiv(f, 2), 128)

    nb = pl.cdiv(n, bt)
    return bt, ft, nb


def batch_norm_1d(x, weight, bias, running_mean, running_var,
                  *, _tile_override=None):
    """Training-mode BatchNorm1d forward.

    x: (N, F); weight/bias/running_mean/running_var: (F,)
    Returns (y, new_running_mean, new_running_var).
    """
    N, F = x.shape
    in_isz = jnp.dtype(x.dtype).itemsize
    out_isz = in_isz

    if _tile_override is None:
        bt, ft, nb = _select_tiles(N, F, in_isz, out_isz)
    else:  # testing hook: force the batch-tiled path at small shapes
        bt, ft = _tile_override
        nb = pl.cdiv(N, bt)

    w2 = weight.reshape(1, F)
    b2 = bias.reshape(1, F)
    rm2 = running_mean.reshape(1, F)

    grid = (pl.cdiv(F, ft), 2 * nb)

    # Phase p in [0, nb): visit batch tile p (stats). Phase p in [nb, 2*nb):
    # visit batch tile p - nb (normalize). For nb == 1 the x block index is
    # identical in both phases, so the DMA is elided and x is read once.
    x_spec = pl.BlockSpec((bt, ft), lambda j, p: (p % nb, j))
    # Output stays parked on batch block 0 during the stats phase (no write,
    # no garbage writeback); it only advances during the normalize phase.
    y_spec = pl.BlockSpec((bt, ft), lambda j, p: (jnp.maximum(p - nb, 0), j))
    p_spec = pl.BlockSpec((1, ft), lambda j, p: (0, j))

    kernel = functools.partial(_bn1d_kernel, n_rows=N, nb=nb, bt=bt,
                               mask_rows=(N % bt != 0))

    # VMEM: double-buffered x & y tiles, ~2 full-tile f32 temps of headroom,
    # double-buffered (1, ft) param rows, 4 f32 scratch rows, plus slack.
    tile_elems = bt * ft
    vmem_limit = (2 * tile_elems * in_isz + 2 * tile_elems * out_isz
                  + 2 * tile_elems * 4 + 10 * 2 * ft * 4 + (2 << 20))
    vmem_cap = _vmem_capacity_bytes()
    vmem_limit = int(max(4 << 20, min(vmem_limit, vmem_cap - (8 << 20))))

    x_reads = 1 if nb == 1 else 2
    cost = pl.CostEstimate(
        flops=6 * N * F,
        transcendentals=F,
        bytes_accessed=(x_reads * N * F * in_isz + N * F * out_isz + 5 * F * 4),
    )

    y, rm_new = pl.pallas_call(
        kernel,
        grid=grid,
        in_specs=[x_spec, p_spec, p_spec, p_spec],
        out_specs=(y_spec, p_spec),
        out_shape=(
            jax.ShapeDtypeStruct((N, F), x.dtype),
            jax.ShapeDtypeStruct((1, F), running_mean.dtype),
        ),
        scratch_shapes=[pltpu.VMEM((1, ft), jnp.float32)] * 4,
        compiler_params=pltpu.CompilerParams(
            dimension_semantics=("parallel", "arbitrary"),
            vmem_limit_bytes=vmem_limit,
        ),
        cost_estimate=cost,
    )(x, w2, b2, rm2)

    # TODO(synk): the original module writes `self.runnin_var` (typo), so
    # running_var is never updated; pass it through unchanged and keep it out
    # of the kernel entirely (a pure pass-through only costs bandwidth).
    return y, rm_new.reshape(F), running_var


if __name__ == "__main__":
    def reference(x, w, b, rm, rv):
        n = x.shape[0]
        mu = jnp.mean(x, axis=0)
        var = jnp.sum((x - mu) ** 2, axis=0) / (n - 1)
        y = w * ((x - mu) / jnp.sqrt(var + EPS)) + b
        rm_new = rm * MOM + mu * (1.0 - MOM)
        return y, rm_new, rv

    # Case 1: small MLP-like shape (module init: weight=1, bias=0). N fits in
    # one batch tile; F spans two lane tiles with a partial (masked) last tile
    # -> exercises the no-pad / no-slice path.
    key = jax.random.PRNGKey(0)
    N, F = 8, 160
    x = jax.random.normal(key, (N, F), dtype=jnp.float32)
    weight = jnp.ones((F,), jnp.float32)          # init.ones_
    bias = jnp.zeros((F,), jnp.float32)           # init.zeros_
    running_mean = jnp.zeros((F,), jnp.float32)
    running_var = jnp.ones((F,), jnp.float32)

    y, rm_new, rv_new = batch_norm_1d(x, weight, bias, running_mean, running_var)
    jax.block_until_ready((y, rm_new, rv_new))
    y_ref, rm_ref, rv_ref = reference(x, weight, bias, running_mean, running_var)
    assert jnp.allclose(y, y_ref, atol=1e-5, rtol=1e-5)
    assert jnp.allclose(rm_new, rm_ref, atol=1e-6, rtol=1e-6)
    assert jnp.allclose(rv_new, rv_ref)

    # Case 2: force the large-N batch-tiled path at a small shape: 3 batch
    # tiles (partial last one -> row masking) and a partial feature tile, with
    # non-trivial weight/bias/running_mean.
    N2, F2 = 20, 160
    x2 = jax.random.normal(jax.random.PRNGKey(1), (N2, F2), dtype=jnp.float32)
    w2 = jax.random.normal(jax.random.PRNGKey(2), (F2,), dtype=jnp.float32)
    b2 = jax.random.normal(jax.random.PRNGKey(3), (F2,), dtype=jnp.float32)
    rm2 = jax.random.normal(jax.random.PRNGKey(4), (F2,), dtype=jnp.float32)
    rv2 = jnp.ones((F2,), jnp.float32)

    y2, rm2_new, rv2_new = batch_norm_1d(x2, w2, b2, rm2, rv2,
                                         _tile_override=(8, 128))
    jax.block_until_ready((y2, rm2_new, rv2_new))
    y2_ref, rm2_ref, rv2_ref = reference(x2, w2, b2, rm2, rv2)
    assert jnp.allclose(y2, y2_ref, atol=1e-5, rtol=1e-5)
    assert jnp.allclose(rm2_new, rm2_ref, atol=1e-6, rtol=1e-6)
    assert jnp.allclose(rv2_new, rv2_ref)

    print("KERNEL_OK")
</pallas_src>

<mosaic_0001>
module attributes {stable_mosaic.version = 11 : i64} {
  func.func @_bn1d_kernel(%arg0: i32, %arg1: i32, %arg2: memref<8x128xf32, #tpu.memory_space<vmem>>, %arg3: memref<1x128xf32, #tpu.memory_space<vmem>>, %arg4: memref<1x128xf32, #tpu.memory_space<vmem>>, %arg5: memref<1x128xf32, #tpu.memory_space<vmem>>, %arg6: memref<8x128xf32, #tpu.memory_space<vmem>>, %arg7: memref<1x128xf32, #tpu.memory_space<vmem>>, %arg8: memref<1x128xf32, #tpu.memory_space<vmem>>, %arg9: memref<1x128xf32, #tpu.memory_space<vmem>>, %arg10: memref<1x128xf32, #tpu.memory_space<vmem>>, %arg11: memref<1x128xf32, #tpu.memory_space<vmem>>) attributes {dimension_semantics = [#tpu.dimension_semantics<parallel>, #tpu.dimension_semantics<arbitrary>], iteration_bounds = array<i64: 2, 2>, scalar_prefetch = 0 : i64, scratch_operands = 4 : i64, tpu.core_type = #tpu.core_type<tc>, window_params = [{transform_indices = @transform_0, window_bounds = array<i64: 8, 128>}, {transform_indices = @transform_1, window_bounds = array<i64: 1, 128>}, {transform_indices = @transform_2, window_bounds = array<i64: 1, 128>}, {transform_indices = @transform_3, window_bounds = array<i64: 1, 128>}, {transform_indices = @transform_4, window_bounds = array<i64: 8, 128>}, {transform_indices = @transform_5, window_bounds = array<i64: 1, 128>}]} {
    %c0_i32 = arith.constant 0 : i32
    %0 = arith.cmpi eq, %arg1, %c0_i32 : i32
    %1 = arith.extui %0 : i1 to i32
    %c0_i32_0 = arith.constant 0 : i32
    %2 = arith.cmpi ne, %1, %c0_i32_0 : i32
    scf.if %2 {
      %cst = arith.constant 0.000000e+00 : f32
      %12 = vector.broadcast %cst : f32 to vector<1x128xf32>
      %c0 = arith.constant 0 : index
      %c0_6 = arith.constant 0 : index
      %13 = vector.load %arg8[%c0, %c0_6] : memref<1x128xf32, #tpu.memory_space<vmem>>, vector<1x128xf32>
      tpu.vector_store %arg8[%c0, %c0_6], %12 {strides = array<i32>} : memref<1x128xf32, #tpu.memory_space<vmem>>, vector<1x128xf32>,
      %cst_7 = arith.constant 0.000000e+00 : f32
      %14 = vector.broadcast %cst_7 : f32 to vector<1x128xf32>
      %c0_8 = arith.constant 0 : index
      %c0_9 = arith.constant 0 : index
      %15 = vector.load %arg9[%c0_8, %c0_9] : memref<1x128xf32, #tpu.memory_space<vmem>>, vector<1x128xf32>
      tpu.vector_store %arg9[%c0_8, %c0_9], %14 {strides = array<i32>} : memref<1x128xf32, #tpu.memory_space<vmem>>, vector<1x128xf32>,
    } else {
    }
    %c1_i32 = arith.constant 1 : i32
    %3 = arith.cmpi slt, %arg1, %c1_i32 : i32
    %4 = arith.extui %3 : i1 to i32
    %c0_i32_1 = arith.constant 0 : i32
    %5 = arith.cmpi ne, %4, %c0_i32_1 : i32
    scf.if %5 {
      %c0 = arith.constant 0 : index
      %c0_6 = arith.constant 0 : index
      %12 = vector.load %arg2[%c0, %c0_6] : memref<8x128xf32, #tpu.memory_space<vmem>>, vector<8x128xf32>
      %c0_7 = arith.constant 0 : index
      %c0_8 = arith.constant 0 : index
      %13 = vector.load %arg8[%c0_7, %c0_8] : memref<1x128xf32, #tpu.memory_space<vmem>>, vector<1x128xf32>
      %cst = arith.constant dense<0.000000e+00> : vector<128xf32>
      %14 = vector.multi_reduction <add>, %12, %cst [0] : vector<8x128xf32> to vector<128xf32>
      %15 = vector.shape_cast %14 : vector<128xf32> to vector<1x128xf32>
      %16 = arith.addf %13, %15 : vector<1x128xf32>
      %c0_9 = arith.constant 0 : index
      %c0_10 = arith.constant 0 : index
      %17 = vector.load %arg8[%c0_9, %c0_10] : memref<1x128xf32, #tpu.memory_space<vmem>>, vector<1x128xf32>
      tpu.vector_store %arg8[%c0_9, %c0_10], %16 {strides = array<i32>} : memref<1x128xf32, #tpu.memory_space<vmem>>, vector<1x128xf32>,
      %c0_11 = arith.constant 0 : index
      %c0_12 = arith.constant 0 : index
      %18 = vector.load %arg9[%c0_11, %c0_12] : memref<1x128xf32, #tpu.memory_space<vmem>>, vector<1x128xf32>
      %19 = arith.mulf %12, %12 : vector<8x128xf32>
      %cst_13 = arith.constant dense<0.000000e+00> : vector<128xf32>
      %20 = vector.multi_reduction <add>, %19, %cst_13 [0] : vector<8x128xf32> to vector<128xf32>
      %21 = vector.shape_cast %20 : vector<128xf32> to vector<1x128xf32>
      %22 = arith.addf %18, %21 : vector<1x128xf32>
      %c0_14 = arith.constant 0 : index
      %c0_15 = arith.constant 0 : index
      %23 = vector.load %arg9[%c0_14, %c0_15] : memref<1x128xf32, #tpu.memory_space<vmem>>, vector<1x128xf32>
      tpu.vector_store %arg9[%c0_14, %c0_15], %22 {strides = array<i32>} : memref<1x128xf32, #tpu.memory_space<vmem>>, vector<1x128xf32>,
    } else {
    }
    %c0_i32_2 = arith.constant 0 : i32
    %6 = arith.cmpi eq, %arg1, %c0_i32_2 : i32
    %7 = arith.extui %6 : i1 to i32
    %c0_i32_3 = arith.constant 0 : i32
    %8 = arith.cmpi ne, %7, %c0_i32_3 : i32
    scf.if %8 {
      %c0 = arith.constant 0 : index
      %c0_6 = arith.constant 0 : index
      %12 = vector.load %arg8[%c0, %c0_6] : memref<1x128xf32, #tpu.memory_space<vmem>>, vector<1x128xf32>
      %cst = arith.constant 8.000000e+00 : f32
      %13 = vector.broadcast %cst : f32 to vector<1x128xf32>
      %14 = arith.divf %12, %13 : vector<1x128xf32>
      %c0_7 = arith.constant 0 : index
      %c0_8 = arith.constant 0 : index
      %15 = vector.load %arg9[%c0_7, %c0_8] : memref<1x128xf32, #tpu.memory_space<vmem>>, vector<1x128xf32>
      %cst_9 = arith.constant 8.000000e+00 : f32
      %16 = vector.broadcast %cst_9 : f32 to vector<1x128xf32>
      %17 = arith.mulf %16, %14 : vector<1x128xf32>
      %18 = arith.mulf %17, %14 : vector<1x128xf32>
      %19 = arith.subf %15, %18 : vector<1x128xf32>
      %cst_10 = arith.constant 8.000000e+00 : f32
      %cst_11 = arith.constant 1.000000e+00 : f32
      %20 = arith.subf %cst_10, %cst_11 : f32
      %21 = vector.broadcast %20 : f32 to vector<1x128xf32>
      %22 = arith.divf %19, %21 : vector<1x128xf32>
      %cst_12 = arith.constant 9.99999974E-6 : f32
      %23 = vector.broadcast %cst_12 : f32 to vector<1x128xf32>
      %24 = arith.addf %22, %23 : vector<1x128xf32>
      %25 = math.rsqrt %24 : vector<1x128xf32>
      %c0_13 = arith.constant 0 : index
      %c0_14 = arith.constant 0 : index
      %26 = vector.load %arg3[%c0_13, %c0_14] : memref<1x128xf32, #tpu.memory_space<vmem>>, vector<1x128xf32>
      %27 = arith.mulf %26, %25 : vector<1x128xf32>
      %c0_15 = arith.constant 0 : index
      %c0_16 = arith.constant 0 : index
      %28 = vector.load %arg10[%c0_15, %c0_16] : memref<1x128xf32, #tpu.memory_space<vmem>>, vector<1x128xf32>
      tpu.vector_store %arg10[%c0_15, %c0_16], %27 {strides = array<i32>} : memref<1x128xf32, #tpu.memory_space<vmem>>, vector<1x128xf32>,
      %c0_17 = arith.constant 0 : index
      %c0_18 = arith.constant 0 : index
      %29 = vector.load %arg4[%c0_17, %c0_18] : memref<1x128xf32, #tpu.memory_space<vmem>>, vector<1x128xf32>
      %30 = arith.mulf %27, %14 : vector<1x128xf32>
      %31 = arith.subf %29, %30 : vector<1x128xf32>
      %c0_19 = arith.constant 0 : index
      %c0_20 = arith.constant 0 : index
      %32 = vector.load %arg11[%c0_19, %c0_20] : memref<1x128xf32, #tpu.memory_space<vmem>>, vector<1x128xf32>
      tpu.vector_store %arg11[%c0_19, %c0_20], %31 {strides = array<i32>} : memref<1x128xf32, #tpu.memory_space<vmem>>, vector<1x128xf32>,
      %c0_21 = arith.constant 0 : index
      %c0_22 = arith.constant 0 : index
      %33 = vector.load %arg5[%c0_21, %c0_22] : memref<1x128xf32, #tpu.memory_space<vmem>>, vector<1x128xf32>
      %cst_23 = arith.constant 0.899999976 : f32
      %34 = vector.broadcast %cst_23 : f32 to vector<1x128xf32>
      %35 = arith.mulf %33, %34 : vector<1x128xf32>
      %cst_24 = arith.constant 1.000000e-01 : f32
      %36 = vector.broadcast %cst_24 : f32 to vector<1x128xf32>
      %37 = arith.mulf %14, %36 : vector<1x128xf32>
      %38 = arith.addf %35, %37 : vector<1x128xf32>
      %c0_25 = arith.constant 0 : index
      %c0_26 = arith.constant 0 : index
      %39 = vector.load %arg7[%c0_25, %c0_26] : memref<1x128xf32, #tpu.memory_space<vmem>>, vector<1x128xf32>
      tpu.vector_store %arg7[%c0_25, %c0_26], %38 {strides = array<i32>} : memref<1x128xf32, #tpu.memory_space<vmem>>, vector<1x128xf32>,
    } else {
    }
    %c1_i32_4 = arith.constant 1 : i32
    %9 = arith.cmpi sge, %arg1, %c1_i32_4 : i32
    %10 = arith.extui %9 : i1 to i32
    %c0_i32_5 = arith.constant 0 : i32
    %11 = arith.cmpi ne, %10, %c0_i32_5 : i32
    scf.if %11 {
      %c0 = arith.constant 0 : index
      %c0_6 = arith.constant 0 : index
      %12 = vector.load %arg2[%c0, %c0_6] : memref<8x128xf32, #tpu.memory_space<vmem>>, vector<8x128xf32>
      %c0_7 = arith.constant 0 : index
      %c0_8 = arith.constant 0 : index
      %13 = vector.load %arg10[%c0_7, %c0_8] : memref<1x128xf32, #tpu.memory_space<vmem>>, vector<1x128xf32>
      %14 = vector.broadcast %13 : vector<1x128xf32> to vector<8x128xf32>
      %15 = arith.mulf %14, %12 : vector<8x128xf32>
      %c0_9 = arith.constant 0 : index
      %c0_10 = arith.constant 0 : index
      %16 = vector.load %arg11[%c0_9, %c0_10] : memref<1x128xf32, #tpu.memory_space<vmem>>, vector<1x128xf32>
      %17 = vector.broadcast %16 : vector<1x128xf32> to vector<8x128xf32>
      %18 = arith.addf %15, %17 : vector<8x128xf32>
      %c0_11 = arith.constant 0 : index
      %c0_12 = arith.constant 0 : index
      %19 = vector.load %arg6[%c0_11, %c0_12] : memref<8x128xf32, #tpu.memory_space<vmem>>, vector<8x128xf32>
      tpu.vector_store %arg6[%c0_11, %c0_12], %18 {strides = array<i32>} : memref<8x128xf32, #tpu.memory_space<vmem>>, vector<8x128xf32>,
    } else {
    }
    return
  }
  func.func @transform_0(%arg0: i32, %arg1: i32) -> (i32, i32) {
    %c1_i32 = arith.constant 1 : i32
    %c0_i32 = arith.constant 0 : i32
    %0 = arith.cmpi eq, %c1_i32, %c0_i32 : i32
    %c1_i32_0 = arith.constant 1 : i32
    %1 = arith.select %0, %c1_i32_0, %c1_i32 : i32
    %2 = arith.remsi %arg1, %1 : i32
    %c0_i32_1 = arith.constant 0 : i32
    %3 = arith.cmpi ne, %2, %c0_i32_1 : i32
    %c0_i32_2 = arith.constant 0 : i32
    %4 = arith.cmpi slt, %2, %c0_i32_2 : i32
    %c0_i32_3 = arith.constant 0 : i32
    %5 = arith.cmpi slt, %1, %c0_i32_3 : i32
    %6 = arith.xori %4, %5 : i1
    %7 = arith.andi %6, %3 : i1
    %8 = arith.addi %2, %1 : i32
    %9 = arith.select %7, %8, %2 : i32
    %c0_i32_4 = arith.constant 0 : i32
    return %9, %arg0 : i32, i32
  }
  func.func @transform_1(%arg0: i32, %arg1: i32) -> (i32, i32) {
    %c0_i32 = arith.constant 0 : i32
    %c0_i32_0 = arith.constant 0 : i32
    return %c0_i32, %arg0 : i32, i32
  }
  func.func @transform_2(%arg0: i32, %arg1: i32) -> (i32, i32) {
    %c0_i32 = arith.constant 0 : i32
    %c0_i32_0 = arith.constant 0 : i32
    return %c0_i32, %arg0 : i32, i32
  }
  func.func @transform_3(%arg0: i32, %arg1: i32) -> (i32, i32) {
    %c0_i32 = arith.constant 0 : i32
    %c0_i32_0 = arith.constant 0 : i32
    return %c0_i32, %arg0 : i32, i32
  }
  func.func @transform_4(%arg0: i32, %arg1: i32) -> (i32, i32) {
    %c1_i32 = arith.constant 1 : i32
    %0 = arith.subi %arg1, %c1_i32 : i32
    %c0_i32 = arith.constant 0 : i32
    %1 = arith.maxsi %0, %c0_i32 : i32
    %c0_i32_0 = arith.constant 0 : i32
    return %1, %arg0 : i32, i32
  }
  func.func @transform_5(%arg0: i32, %arg1: i32) -> (i32, i32) {
    %c0_i32 = arith.constant 0 : i32
    %c0_i32_0 = arith.constant 0 : i32
    return %c0_i32, %arg0 : i32, i32
  }
}

</mosaic_0001>

<bundles_post_ra>
// kernel: tpu_custom_call.1
= control target key start
LH: loop header
LB: loop body
LE: loop exit
PB: predicated region body
PF: predicated region fallthrough
CT: control target
= control target key end

     0   :  { %s1309_s0 = inlined_call_operand.hbm [shape: f32[8,160], index: 0, kind: input, shape index: {}]   ;;  %s1310_s1 = inlined_call_operand.hbm [shape: f32[1,160], index: 1, kind: input, shape index: {}]   ;;  %s1311_s2 = inlined_call_operand.vmem [shape: f32[1,160], index: 2, kind: input, shape index: {}]   ;;  %s1312_s3 = inlined_call_operand.vmem [shape: f32[1,160], index: 3, kind: input, shape index: {}]   ;;  %s1313_s4 = inlined_call_operand.hbm [shape: f32[8,160], index: 4, kind: output, shape index: {0}]   ;;  %s1314_s5 = inlined_call_operand.hbm [shape: f32[1,160], index: 5, kind: output, shape index: {1}]  }
   0x1   :  { %1320 = sst [smem:[#allocation26_spill]] %s1309_s0 }
   0x2   :  { %1321 = sst [smem:[#allocation27_spill]] %s1310_s1 }
   0x3   :  { %1322 = sst [smem:[#allocation28_spill]] %s1311_s2 }
   0x4   :  { %11 = vsyncpa [#allocation7], 0 }
   0x5   :  { %13 = vsyncpa [#allocation7 + $0x1], 0 }
   0x6   :  { %14 = vsyncpa [#allocation10], 0 }
   0x7   :  { %16 = vsyncpa [#allocation10 + $0x1], 0 }
   0x8   :  { %17 = vsyncpa [#allocation8], 0 }
   0x9   :  { %19 = vsyncpa [#allocation8 + $0x1], 0 }
   0xa   :  { %20 = vsyncpa [#allocation13], 0 }
   0xb   :  { %22 = vsyncpa [#allocation13 + $0x1], 0  ;;  %s985_s18 = smov 0   ;;  %s987_s19 = smov 0  }
   0xc   :  { %s989_s20 = smov 0   ;;  %s991_s21 = smov 0  }
   0xd   :  { %s993_s22 = smov 0   ;;  %s995_s23 = smov 0  }
   0xe   :  { %s997_s24 = smov 0   ;;  %s999_s25 = smov 0  }
   0xf   :  { %s1001_s26 = smov 0   ;;  %s1003_s27 = smov 0  }
  0x10   :  { %s1005_s28 = smov 0  }
  0x11 LB: > { %1323 = sst [smem:[#allocation18_spill]] %s916_s20  ;;  %s598_s29 = sadd.s32 4294967295, %s948_s28   ;;  %s948_s28 = sphi %s1005_s28, %s28_s28   ;;  %s944_s27 = sphi %s1003_s27, %s1358_s27   ;;  %s940_s26 = sphi %s1001_s26, %s1351_s26   ;;  %s936_s25 = sphi %s999_s25, %s1357_s25   ;;  %s932_s24 = sphi %s997_s24, %s1350_s24   ;;  %s928_s23 = sphi %s995_s23, %s1349_s23   ;;  %s924_s22 = sphi %s993_s22, %s1356_s22   ;;  %s920_s21 = sphi %s991_s21, %s1355_s21   ;;  %s916_s20 = sphi %s989_s20, %s1347_s20   ;;  %s912_s19 = sphi %s987_s19, %s1354_s19   ;;  %s908_s18 = sphi %s985_s18, %s1353_s18  }
  0x12   : > { %1324 = sst [smem:[#allocation19_spill]] %s928_s23  ;;  %s599_s30 = sadd.s32 4294967294, %s948_s28  }
  0x13   : > { %1325 = sst [smem:[#allocation20_spill]] %s940_s26  ;;  %s37_s6 = sadd.s32 1, %s940_s26 }
  0x14   : > { %s40_s7 = sadd.s32 1, %s944_s27  ;;  %p38_p0 = scmp.ge.s32.totalorder %s37_s6, 2 }
  0x15   : > { %s47_s8 = sadd.s32 1, %s928_s23  ;;  %p54_p1 = scmp.ne.s32.totalorder %s928_s23, %s924_s22 }
  0x16   : > { %p55_p2 = scmp.eq.s32.totalorder %s948_s28, 0  ;;  %s1360_s6 = smov (%p38_p0, %s37_s6), 0 }
  0x17   : > { %1326 = sst [smem:[#allocation21_spill]] %s1360_s6  ;;  %s1362_s7 = smov (!%p38_p0, %s40_s7), %s944_s27 }
  0x18   : > { %p1054_p3 = por %p55_p2, %p54_p1  ;;  %p60_p4 = scmp.ne.s32.totalorder %s924_s22, %s920_s21 }
  0x19   : > { %p42_p5 = scmp.ge.s32.totalorder %s1362_s7, 2  ;;  %p61_p6 = scmp.eq.s32.totalorder %s598_s29, 0 }
  0x1a   : > { %s159_s12 = sadd.s32 1, %s916_s20  ;;  %p169_p9 = scmp.ne.s32.totalorder %s916_s20, %s912_s19 }
  0x1b   : > { %s1364_s7 = smov (%p42_p5, %s1362_s7), 0  ;;  %p1065_p7 = por %p61_p6, %p60_p4 }
  0x1c   : > { %1328 = sst [smem:[#allocation22_spill]] %s1364_s7  ;;  %s44_s11 = ssub.s32 %s944_s27, %s1364_s7 }
  0x1d   : > { %p45_p8 = scmp.eq.s32.totalorder %s44_s11, 0  ;;  %p170_p10 = scmp.eq.s32.totalorder %s598_s29, 3 }
  0x1e   : > { %p175_p11 = scmp.ne.s32.totalorder %s912_s19, %s908_s18  ;;  %p176_p13 = scmp.eq.s32.totalorder %s599_s30, 3 }
  0x1f   : > { %s1073_s13 = scalar_select %p45_p8, %s928_s23, %s47_s8  }
  0x20   : > { %p1079_p12 = por %p170_p10, %p169_p9  ;;  %p1086_p0 = por %p170_p10, %p54_p1 }
  0x21   : > { %1330 = sst [smem:[#allocation23_spill]] %s1073_s13  ;;  %p1093_p2 = por %p176_p13, %p175_p11 }
  0x22   : > { %s1091_s16 = scalar_select %p45_p8, %s916_s20, %s159_s12  }
  0x23   : > { %s1334_s17 = scalar_select %p1093_p2, 1, 0 }
  0x24   : > { %1333 = sst [smem:[#allocation24_spill]] %s1091_s16  ;;  %p1100_p5 = por %p176_p13, %p60_p4 }
  0x25   : > { %p645_p6 = scmp.lt.s32.totalorder %s948_s28, 4  ;;  %s1106_s8 = sand.u32 1, %s928_s23  }
  0x26   : > { %s1335_s29 = scalar_select %p1100_p5, 1, 0 }
  0x27   : > { %s604_s30 = sshll.u32 %s1106_s8, 3  ;;  %s605_s11 = sshll.u32 %s944_s27, 7 }
  0x28   : > { %1336 = sst [smem:[#allocation25_spill]] %s1335_s29  ;;  %s226_s26 = scalar_lea.vmem [#allocation6], %s604_s30 }
  0x29   : > { %s1337_s0 = sld [smem:[#allocation26_spill]]  ;;  %s233_s13 = sshll.u32 %s226_s26, 4  ;;  %s234_s13 = int_to_ptr.vmem [resolvable:$true] %s233_s13 }
  0x2a   : > { %p1115_p1 = pnand %p645_p6, %p1054_p3  ;;  %p607_p4 = scmp.ge.s32.totalorder %s948_s28, 1 }
  0x2b   : > { %p267_p8 = scmp.lt.s32.totalorder %s948_s28, 5  ;;  %s223_s23 = scalar_lea.sflag [#allocation7], %s1106_s8 }
  0x2c   : > { %p740_p9 = pneg %p1115_p1  ;;  %s751_s20 = scalar_lea.vmem %s234_s13, 128 }
  0x2d   : > { %p752_p10 = scmp.ne.s32.totalorder %s234_s13, %s751_s20  ;;  %s950_s26 = smov [#allocation6]  }
  0x2e   : > { %s756_s6 = sshll.u32 %s950_s26, 4  ;;  %s757_s6 = int_to_ptr.vmem [resolvable:$false] %s756_s6 }
  0x2f   : > { %s231_s12 = scalar_lea.hbm %s1337_s0, %s605_s11  ;;  %p754_p11 = pnand %p752_p10, %p740_p9 }
  0x30   : > { %s758_s7 = scalar_lea.vmem %s757_s6, 256  ;;  %p759_p3 = scmp.lt.s32.totalorder %s234_s13, %s757_s6 }
  0x31   : > { %p755_p13 = pneg %p754_p11  ;;  %p760_p6 = scmp.lt.s32.totalorder %s758_s7, %s751_s20 }
  0x33   : > { %p761_p5 = por %p760_p6, %p759_p3 }
  0x35   : > { %p762_p2 = pnand %p761_p5, %p755_p13 }
  0x37   : > { %765 = shalt.err (!%p762_p2)
}
  0x38   : > { %634 = dma.hbm_to_vmem [thread:$0]  (!%p1115_p1), %s231_s12, 128, %s234_s13, %s223_s23  }
  0x39   : > { %p1133_p10 = pnand %p607_p4, %p267_p8  ;;  %s606_s30 = sshll.u32 %s944_s27, 4 }
  0x3a   : > { %s243_s20 = scalar_lea.vmem [#allocation9], %s1106_s8  ;;  %s1340_s1 = sld [smem:[#allocation27_spill]] }
  0x3b   : > { %s250_s11 = sshll.u32 %s243_s20, 4  ;;  %s241_s0 = scalar_lea.sflag [#allocation10], %s1106_s8  ;;  %s251_s11 = int_to_ptr.vmem [resolvable:$true] %s250_s11 }
  0x3c   : > { %s779_s29 = scalar_lea.vmem %s251_s11, 16  ;;  %s951_s23 = smov [#allocation9]  }
  0x3d   : > { %p780_p2 = scmp.ne.s32.totalorder %s251_s11, %s779_s29  ;;  %s784_s13 = sshll.u32 %s951_s23, 4  ;;  %s785_s13 = int_to_ptr.vmem [resolvable:$false] %s784_s13 }
  0x3e   : > { %s786_s12 = scalar_lea.vmem %s785_s13, 32  ;;  %p787_p4 = scmp.lt.s32.totalorder %s251_s11, %s785_s13 }
  0x3f   : > { %p782_p5 = pnand %p780_p2, %p740_p9  ;;  %p788_p8 = scmp.lt.s32.totalorder %s786_s12, %s779_s29 }
  0x40   : > { %s248_s7 = scalar_lea.hbm %s1340_s1, %s606_s30 }
  0x41   : > { %p783_p11 = pneg %p782_p5  ;;  %p789_p13 = por %p788_p8, %p787_p4 }
  0x43   : > { %p790_p3 = pnand %p789_p13, %p783_p11 }
  0x45   : > { %793 = shalt.err (!%p790_p3)
}
  0x46   : > { %637 = dma.hbm_to_vmem [thread:$0]  (!%p1115_p1), %s248_s7, 16, %s251_s11, %s241_s0  }
  0x47   : > { %271 = sbr.rel (%p1133_p10) target bundleno = 219 (0xdb), region = 36  ;;  %s1151_s8 = sand.u32 (!%p1133_p10), 1, %s924_s22  }
  0x48   : > { %s608_s30 = sshll.u32 (!%p1133_p10), %s1151_s8, 3  ;;  %s274_s20 = scalar_lea.sflag (!%p1133_p10), [#allocation7], %s1151_s8 }
  0x49   : > { %s1155_s26 = scalar_lea.vmem (!%p1133_p10), [#allocation6], %s608_s30 }
  0x4c   : > { %891 = dma.done.wait (%p1065_p7), %s274_s20, 128  }
  0x4d   : > { %893 = vsyncadd (%p1065_p7), %s274_s20, 4294967168  ;;  %s283_s0 = scalar_lea.sflag [#allocation10], %s1151_s8  ;;  %s285_s16 = scalar_lea.vmem [#allocation9], %s1151_s8 }
  0x4e   : > { %895 = dma.done.wait (%p1065_p7), %s283_s0, 16  }
  0x4f   : > { %897 = vsyncadd (%p1065_p7), %s283_s0, 4294967280  ;;  %s317_s29 = sand.u32 1, %s912_s19   ;;  %p326_p1 = scmp.lt.s32.totalorder %s936_s25, 1 }
  0x50   : > { %s1170_s9 = sshll.u32 %s317_s29, 3  ;;  %s1341_s2 = sld [smem:[#allocation28_spill]] }
  0x51   : > { %s1174_s11 = scalar_select %p326_p1, %s936_s25, 1 }
  0x52   : > { %s319_s30 = scalar_lea.vmem [#allocation11], %s1170_s9  ;;  %s325_s20 = scalar_lea.vmem [#allocation12], %s1151_s8 }
  0x53   : > { %s331_s12 = scalar_lea.vmem %s1312_s3, %s1174_s11  ;;  %p610_p7 = scmp.ne.s32.totalorder %s932_s24, 0 }
  0x55   : > { %338 = sbr.rel (%p610_p7) target bundleno = 92 (0x5c), region = 48 }
  0x56   : > { %s328_s10 = scalar_lea.vmem %s1341_s2, %s1174_s11 }
  0x5a   : > { %v952_v0 = vmov 0.0  }
  0x5b   : > { %339 = vst [vmem:[#allocation2] sm:$0x1] %v952_v0  ;;  %340 = vst [vmem:[#allocation3] sm:$0x1] %v952_v0 }
  0x5c PF: > { %p611_p9 = scmp.ge.s32.totalorder %s932_s24, 1 }
  0x5e   : > { %344 = sbr.rel (%p611_p9) target bundleno = 117 (0x75), region = 52 }
  0x63   : > { %v345_v1 = vld [vmem:[%s1155_s26] sm:$0xff]  ;;  %v346_v12 = vld [vmem:[#allocation2] sm:$0x1]  ;;  %v355_v15 = vld [vmem:[#allocation3] sm:$0x1] }
  0x64   : > { %v347_v2 = vrot.slane %v345_v1, 4  ;;  %v356_v3 = vmul.f32 %v345_v1, %v345_v1 }
  0x66   : > { %v348_v4 = vadd.f32 %v347_v2, %v345_v1  ;;  %v357_v5 = vrot.slane %v356_v3, 4 }
  0x68   : > { %v349_v6 = vrot.slane %v348_v4, 2  ;;  %v358_v7 = vadd.f32 %v357_v5, %v356_v3 }
  0x6a   : > { %v350_v8 = vadd.f32 %v349_v6, %v348_v4  ;;  %v359_v9 = vrot.slane %v358_v7, 2 }
  0x6c   : > { %v351_v10 = vrot.slane %v350_v8, 1  ;;  %v360_v11 = vadd.f32 %v359_v9, %v358_v7 }
  0x6e   : > { %v352_v13 = vadd.f32 %v351_v10, %v350_v8  ;;  %v361_v14 = vrot.slane %v360_v11, 1 }
  0x70   : > { %v353_v16 = vadd.f32 %v352_v13, %v346_v12  ;;  %v362_v17 = vadd.f32 %v361_v14, %v360_v11 }
  0x72   : > { %354 = vst [vmem:[#allocation2] sm:$0x1] %v353_v16  ;;  %v363_v18 = vadd.f32 %v362_v17, %v355_v15 }
  0x74   : > { %364 = vst [vmem:[#allocation3] sm:$0x1] %v363_v18 }
  0x75 PF: > { %367 = sbr.rel (%p610_p7) target bundleno = 156 (0x9c), region = 56 }
  0x7a   : > { %v368_v19 = vld [vmem:[#allocation2] sm:$0x1] }
  0x7b   : > { %v370_v20 = vmul.f32 0.125, %v368_v19  ;;  %v386_v21 = vld [vmem:[%s331_s12] sm:$0x1]  ;;  %v371_v25 = vld [vmem:[#allocation3] sm:$0x1] }
  0x7c   : > { %v387_v22 = vmul.f32 0.9, %v386_v21  ;;  %v379_v31 = vld [vmem:[%s285_s16] sm:$0x1] }
  0x7d   : > { %v372_v23 = vmul.f32 8.0, %v370_v20  ;;  %v388_v24 = vmul.f32 0.1, %v370_v20  ;;  %v382_v34 = vld [vmem:[%s328_s10] sm:$0x1] }
  0x7f   : > { %v373_v26 = vmul.f32 %v372_v23, %v370_v20  ;;  %v389_v27 = vadd.f32 %v388_v24, %v387_v22 }
  0x81   : > { %v374_v28 = vsub.f32 %v371_v25, %v373_v26  ;;  %390 = vst [vmem:[%s325_s20] sm:$0x1] %v389_v27 }
  0x83   : > { %v376_v29 = vmul.f32 0.14285715, %v374_v28 }
  0x85   : > { %v377_v30 = vadd.f32 1e-05, %v376_v29 }
  0x87   : > { %736 = vrsqrt.f32 %v377_v30 }
  0x94   : > { %v737_v32 = vpop.eup %736 }
  0x95   : > { %v380_v33 = vmul.f32 %v737_v32, %v379_v31 }
  0x97   : > { %381 = vst [vmem:[#allocation4] sm:$0x1] %v380_v33  ;;  %v383_v35 = vmul.f32 %v380_v33, %v370_v20 }
  0x99   : > { %v384_v36 = vsub.f32 %v382_v34, %v383_v35 }
  0x9b   : > { %385 = vst [vmem:[#allocation5] sm:$0x1] %v384_v36 }
  0x9c PF: > { %p613_p6 = scmp.lt.s32.totalorder %s932_s24, 1 }
  0x9e   : > { %394 = sbr.rel (%p613_p6) target bundleno = 169 (0xa9), region = 60 }
  0xa3   : > { %v395_v37 = vld [vmem:[%s1155_s26] sm:$0xff]  ;;  %v614_v38 = vld [vmem:[#allocation4] ss:$0 sm:$0xff]  ;;  %v615_v39 = vld [vmem:[#allocation5] ss:$0 sm:$0xff] }
  0xa4   : > { %v403_v40 = vmul.f32 %v614_v38, %v395_v37 }
  0xa6   : > { %v411_v41 = vadd.f32 %v615_v39, %v403_v40 }
  0xa8   : > { %412 = vst [vmem:[%s319_s30] sm:$0xff] %v411_v41 }
  0xa9 PF: > { %s617_s16 = sadd.s32 4294967295, %s932_s24  ;;  %s436_s11 = sshll.u32 %s319_s30, 4  ;;  %s1214_s11 = int_to_ptr.vmem [resolvable:$true] %s436_s11 }
  0xaa   : > { %p426_p10 = scmp.gt.s32.totalorder %s617_s16, 0  ;;  %s620_s26 = sshll.u32 %s936_s25, 4 }
  0xab   : > { %s449_s10 = sshll.u32 %s325_s20, 4  ;;  %s1223_s7 = scalar_lea.hbm %s1314_s5, %s620_s26  ;;  %s1225_s10 = int_to_ptr.vmem [resolvable:$true] %s449_s10 }
  0xac   : > { %s1366_s16 = smov (!%p426_p10, %s617_s16), 0  ;;  %s414_s1 = scalar_lea.sflag [#allocation8], %s317_s29 }
  0xad   : > { %s618_s13 = sshll.u32 %s1366_s16, 1  ;;  %s794_s2 = scalar_lea.vmem %s1214_s11, 128 }
  0xae   : > { %s432_s12 = sadd.s32 %s936_s25, %s618_s13  ;;  %p795_p2 = scmp.ne.s32.totalorder %s1214_s11, %s794_s2 }
  0xaf   : > { %s619_s24 = sshll.u32 %s432_s12, 7  ;;  %s953_s25 = smov [#allocation11]  }
  0xb0   : > { %s434_s23 = scalar_lea.hbm %s1313_s4, %s619_s24  ;;  %p796_p5 = pnand %p795_p2, %p1079_p12 }
  0xb1   : > { %s798_s20 = sshll.u32 %s953_s25, 4  ;;  %s799_s20 = int_to_ptr.vmem [resolvable:$false] %s798_s20 }
  0xb2   : > { %p797_p11 = pneg %p796_p5  ;;  %s800_s16 = scalar_lea.vmem %s799_s20, 256 }
  0xb3   : > { %p801_p4 = scmp.lt.s32.totalorder %s1214_s11, %s799_s20  ;;  %p802_p8 = scmp.lt.s32.totalorder %s800_s16, %s794_s2 }
  0xb5   : > { %p803_p13 = por %p802_p8, %p801_p4 }
  0xb7   : > { %p804_p3 = pnand %p803_p13, %p797_p11 }
  0xb9   : > { %807 = shalt.err (!%p804_p3)
}
  0xba   : > { %s808_s26 = scalar_lea.hbm %s434_s23, 128  ;;  %s812_s12 = scalar_lea.hbm %s1313_s4, 256 }
  0xbb   : > { %p809_p1 = scmp.ne.s32.totalorder %s434_s23, %s808_s26  ;;  %p813_p6 = scmp.lt.s32.totalorder %s434_s23, %s1313_s4 }
  0xbc   : > { %p814_p10 = scmp.lt.s32.totalorder %s812_s12, %s808_s26 }
  0xbd   : > { %p810_p7 = pnand %p809_p1, %p1079_p12 }
  0xbe   : > { %p815_p2 = por %p814_p10, %p813_p6 }
  0xbf   : > { %p811_p9 = pneg %p810_p7 }
  0xc1   : > { %p816_p5 = pnand %p815_p2, %p811_p9 }
  0xc3   : > { %819 = shalt.err (!%p816_p5)
}
  0xc4   : > { %627 = dma.vmem_to_hbm [thread:$0]  (%p1079_p12), %s1214_s11, 128, %s434_s23, %s414_s1  }
  0xc5   : > { %s419_s2 = scalar_lea.sflag [#allocation13], %s1151_s8  ;;  %s820_s24 = scalar_lea.vmem %s1225_s10, 16 }
  0xc6   : > { %p821_p11 = scmp.ne.s32.totalorder %s1225_s10, %s820_s24  ;;  %s954_s9 = smov [#allocation12]  }
  0xc7   : > { %s824_s30 = sshll.u32 %s954_s9, 4  ;;  %s825_s30 = int_to_ptr.vmem [resolvable:$false] %s824_s30 }
  0xc8   : > { %p822_p4 = pnand %p821_p11, %p1086_p0  ;;  %s826_s25 = scalar_lea.vmem %s825_s30, 32 }
  0xc9   : > { %p827_p13 = scmp.lt.s32.totalorder %s1225_s10, %s825_s30  ;;  %p828_p3 = scmp.lt.s32.totalorder %s826_s25, %s820_s24 }
  0xca   : > { %p823_p8 = pneg %p822_p4 }
  0xcb   : > { %p829_p1 = por %p828_p3, %p827_p13 }
  0xcd   : > { %p830_p7 = pnand %p829_p1, %p823_p8 }
  0xcf   : > { %833 = shalt.err (!%p830_p7)
}
  0xd0   : > { %s834_s1 = scalar_lea.hbm %s1223_s7, 16  ;;  %s838_s11 = scalar_lea.hbm %s1314_s5, 32 }
  0xd1   : > { %p835_p12 = scmp.ne.s32.totalorder %s1223_s7, %s834_s1  ;;  %p839_p10 = scmp.lt.s32.totalorder %s1223_s7, %s1314_s5 }
  0xd2   : > { %p840_p2 = scmp.lt.s32.totalorder %s838_s11, %s834_s1 }
  0xd3   : > { %p836_p9 = pnand %p835_p12, %p1086_p0 }
  0xd4   : > { %p841_p5 = por %p840_p2, %p839_p10 }
  0xd5   : > { %p837_p6 = pneg %p836_p9 }
  0xd7   : > { %p842_p11 = pnand %p841_p5, %p837_p6 }
  0xd9   : > { %845 = shalt.err (!%p842_p11)
}
  0xda   : > { %628 = dma.vmem_to_hbm [thread:$0]  (%p1086_p0), %s1225_s10, 16, %s1223_s7, %s419_s2  }
  0xdb PF: > { %p646_p4 = scmp.ge.s32.totalorder %s948_s28, 2  ;;  %s461_s16 = sand.u32 1, %s908_s18  }
  0xdc   : > { %p1343_p8 = scmp.ne.s32.totalorder %s1334_s17, 0  ;;  %s462_s26 = scalar_lea.sflag [#allocation8], %s461_s16 }
  0xde   : > { %p639_p13 = pnand %p646_p4, %p1343_p8 }
  0xe0   : > { %p640_p3 = pneg %p639_p13 }
  0xe2   : > { %899 = dma.done.wait (%p640_p3), %s462_s26, 128  }
  0xe3   : > { %901 = vsyncadd (%p640_p3), %s462_s26, 4294967168  ;;  %s1344_s29 = sld [smem:[#allocation25_spill]]  ;;  %s470_s13 = sand.u32 1, %s920_s21  }
  0xe4   : > { %s471_s15 = scalar_lea.sflag [#allocation13], %s470_s13 }
  0xe9   : > { %p1345_p1 = scmp.ne.s32.totalorder %s1344_s29, 0 }
  0xeb   : > { %p642_p7 = pnand %p646_p4, %p1345_p1 }
  0xed   : > { %p643_p12 = pneg %p642_p7 }
  0xef   : > { %903 = dma.done.wait (%p643_p12), %s471_s15, 16  }
  0xf0   : > { %905 = vsyncadd (%p643_p12), %s471_s15, 4294967280  ;;  %s28_s28 = sadd.s32 1, %s948_s28   ;;  %s1346_s10 = sld [smem:[#allocation18_spill]] }
  0xf1   : > { %p25_p0 = scmp.ge.s32.totalorder %s28_s28, 6   ;;  %s1347_s20 = sld [smem:[#allocation24_spill]] }
  0xf2   : > { %s1348_s17 = sld [smem:[#allocation19_spill]]  ;;  %s1353_s18 = smov %s912_s19 }
  0xf3   : > { %s1349_s23 = sld [smem:[#allocation23_spill]]  ;;  %s1355_s21 = smov %s924_s22 }
  0xf4   : > { %s1350_s24 = sld [smem:[#allocation20_spill]]  ;;  %s1357_s25 = smov %s944_s27 }
  0xf5   : > { %s1351_s26 = sld [smem:[#allocation21_spill]] }
  0xf6   : > { %s1352_s7 = sld [smem:[#allocation22_spill]]  ;;  %s1354_s19 = smov %s1346_s10 }
  0xf8   : > { %s1356_s22 = smov %s1348_s17  ;;  %27 = sbr.rel (!%p25_p0) target bundleno = 17 (0x11), region = 133 }
  0xfc   : > { %s1358_s27 = smov %s1352_s7 }
  0xfd   :  { %475 = vsyncpa [#allocation7], 1 }
  0xfe   :  { %477 = vsyncpa [#allocation7 + $0x1], 1 }
  0xff   :  { %478 = vsyncpa [#allocation10], 1 }
 0x100   :  { %480 = vsyncpa [#allocation10 + $0x1], 1 }
 0x101   :  { %481 = vsyncpa [#allocation8], 1 }
 0x102   :  { %483 = vsyncpa [#allocation8 + $0x1], 1 }
 0x103   :  { %484 = vsyncpa [#allocation13], 1 }
 0x104   :  { %486 = vsyncpa [#allocation13 + $0x1], 1 }

</bundles_post_ra>
